<compile_context>
chip_gen: v5e
topology: v5e:2x2
jax: 0.10.0
libtpu: 0.0.40
codegen_flags: <defaults>
</compile_context>

<pallas_src>
import functools

import jax
import jax.numpy as jnp
from jax.experimental import pallas as pl
from jax.experimental.pallas import tpu as pltpu


def _round_up(x, m):
    return ((x + m - 1) // m) * m


def _cdiv(a, b):
    return -(-a // b)


# Single-buffering request for weights whose block never changes across grid steps.
try:
    _BUFFERED_ONE = pl.Buffered(1)
except Exception:  # older JAX without pl.Buffered
    _BUFFERED_ONE = None


def _resident_spec(m, n):
    """Constant-index weight/bias block; single-buffered when the API supports it."""
    index_map = lambda i: (0, 0)
    if _BUFFERED_ONE is not None:
        try:
            return pl.BlockSpec((m, n), index_map, pipeline_mode=_BUFFERED_ONE)
        except TypeError:  # pipeline_mode kwarg unsupported
            pass
    return pl.BlockSpec((m, n), index_map)


def _fused_kernel(text_ref, img_ref, tab_ref,
                  w1_ref, b1_ref,
                  w3t_ref, w3v_ref, w23_ref, b3_ref,
                  w4_ref, b4_ref,
                  out_ref):
    cdt = w1_ref.dtype  # bf16 compute dtype for MXU operands

    # --- tabular_fc[0:3]: Linear(tab_in,128) -> ReLU  (Dropout = identity, eval mode)
    h1 = jnp.dot(tab_ref[...].astype(cdt), w1_ref[...],
                 preferred_element_type=jnp.float32)
    h1 = jnp.maximum(h1 + b1_ref[...], 0.0)

    # --- fc[0]: Linear(text + vision + tab_emb, 512) on the implicit concatenation.
    #     tabular_fc[3] (Linear(128,64)) is folded into w23 = w2 @ w3_tab in the wrapper.
    z = (jnp.dot(text_ref[...].astype(cdt), w3t_ref[...],
                 preferred_element_type=jnp.float32)
         + jnp.dot(img_ref[...].astype(cdt), w3v_ref[...],
                   preferred_element_type=jnp.float32)
         + jnp.dot(h1.astype(cdt), w23_ref[...],
                   preferred_element_type=jnp.float32)
         + b3_ref[...])
    h2 = jnp.maximum(z, 0.0)          # ReLU ; Dropout = identity (eval)

    # --- fc[3]: Linear(512, num_classes), classifier padded to lane-dense 128 columns.
    out = jnp.dot(h2.astype(cdt), w4_ref[...],
                  preferred_element_type=jnp.float32) + b4_ref[...]
    out_ref[...] = out.astype(out_ref.dtype)


def prepare_kernel_params(params, text_dim, vision_dim, *, compute_dtype=jnp.bfloat16):
    """Fold / pad / cast PyTorch-style params.

    Returns (weights, meta): `weights` contains only jnp arrays (safe to pass through
    jit); `meta` holds Python-int bookkeeping used outside the jitted impl.
    """
    w1 = jnp.asarray(params["w1"], jnp.float32)           # (tab_in, 128)
    tab_in = w1.shape[0]
    num_classes = params["w4"].shape[1]
    tab_pad = _round_up(max(tab_in, 8), 16)                # small padding only
    out_pad = _round_up(max(num_classes, 8), 128)          # lane-dense classifier

    w1p = jnp.pad(w1, ((0, tab_pad - tab_in), (0, 0)))

    # split fusion weight along its input axis to realize the concat in-kernel
    w3 = jnp.asarray(params["w3"], jnp.float32)
    w3_text = w3[:text_dim]
    w3_vision = w3[text_dim:text_dim + vision_dim]
    w3_tab = w3[text_dim + vision_dim:]                    # (64, 512)

    # fold tabular Linear(128,64) into fc[0]'s tabular block (no nonlinearity between)
    w23 = params["w2"] @ w3_tab                            # (128, 512)
    b3f = params["b3"] + params["b2"] @ w3_tab             # (1, 512)

    w4p = jnp.pad(params["w4"], ((0, 0), (0, out_pad - num_classes)))
    b4p = jnp.pad(params["b4"], ((0, 0), (0, out_pad - num_classes)))

    weights = {
        "w1": w1p.astype(compute_dtype), "b1": params["b1"].astype(jnp.float32),
        "w3_text": w3_text.astype(compute_dtype),
        "w3_vision": w3_vision.astype(compute_dtype),
        "w23": w23.astype(compute_dtype), "b3": b3f.astype(jnp.float32),
        "w4": w4p.astype(compute_dtype), "b4": b4p.astype(jnp.float32),
    }
    meta = {"num_classes": num_classes, "tab_in": tab_in,
            "tab_pad": tab_pad, "out_pad": out_pad,
            "text_dim": text_dim, "vision_dim": vision_dim}
    return weights, meta


@functools.partial(jax.jit, static_argnames=("tile_b",))
def _multimodal_head_impl(text_emb, image_emb, tabular, weights, tile_b):
    B, text_dim = text_emb.shape
    vision_dim = image_emb.shape[1]
    tab_in = tabular.shape[1]
    tab_pad = weights["w1"].shape[0]
    out_pad = weights["w4"].shape[1]

    # Balanced batch tiling:
    #  * >= 2 grid steps when there is enough work so ("parallel",) shards across both
    #    v7x TensorCores,
    #  * tile rounded to 16 sublanes (bf16 packing of the cast intermediates),
    #  * padding waste bounded by one tile's rounding.
    n_steps = max(1, _cdiv(B, tile_b))
    if B >= 32:
        n_steps = max(n_steps, 2)
    tb = _round_up(_cdiv(B, n_steps), 16)
    B_pad = n_steps * tb
    pad_b = B_pad - B

    # Inputs stay f32 in HBM (no wrapper-side pad+astype pass over text/img); the kernel
    # casts to bf16 right before the MXU dots. Pad only when actually needed.
    text = text_emb if pad_b == 0 else jnp.pad(text_emb, ((0, pad_b), (0, 0)))
    img = image_emb if pad_b == 0 else jnp.pad(image_emb, ((0, pad_b), (0, 0)))
    if pad_b == 0 and tab_pad == tab_in:
        tab = tabular
    else:
        tab = jnp.pad(tabular, ((0, pad_b), (0, tab_pad - tab_in)))

    act = lambda n: pl.BlockSpec((tb, n), lambda i: (i, 0))     # batch-tiled activations
    res = _resident_spec                                         # resident weights/biases

    grid_spec = pltpu.PrefetchScalarGridSpec(
        num_scalar_prefetch=0,
        grid=(B_pad // tb,),
        in_specs=[
            act(text_dim), act(vision_dim), act(tab_pad),
            res(tab_pad, 128), res(1, 128),
            res(text_dim, 512), res(vision_dim, 512), res(128, 512), res(1, 512),
            res(512, out_pad), res(1, out_pad),
        ],
        out_specs=pl.BlockSpec((tb, out_pad), lambda i: (i, 0)),
    )

    return pl.pallas_call(
        _fused_kernel,
        out_shape=jax.ShapeDtypeStruct((B_pad, out_pad), jnp.bfloat16),
        grid_spec=grid_spec,
        compiler_params=pltpu.CompilerParams(
            dimension_semantics=("parallel",),
            vmem_limit_bytes=48 * 1024 * 1024),
    )(text, img, tab,
      weights["w1"], weights["b1"],
      weights["w3_text"], weights["w3_vision"], weights["w23"], weights["b3"],
      weights["w4"], weights["b4"])


def multimodal_head(text_emb, image_emb, tabular, weights, meta, *, tile_b=1024):
    """Fused tabular-MLP + concat + classification head. Returns (B, num_classes) f32."""
    B = text_emb.shape[0]
    out = _multimodal_head_impl(text_emb, image_emb, tabular, weights, tile_b)
    # bf16 kernel writeback halves output HBM traffic; the slice+cast below touches only
    # the tiny (B, num_classes) logits tensor.
    return out[:B, :meta["num_classes"]].astype(jnp.float32)


def init_params(key, text_dim, vision_dim, tab_in, num_classes):
    """Deterministic PyTorch-Linear-style init; weights stored (in, out); f32."""
    def linear(k, fan_in, fan_out):
        kw, kb = jax.random.split(k)
        bound = 1.0 / jnp.sqrt(fan_in)
        w = jax.random.uniform(kw, (fan_in, fan_out), jnp.float32, -bound, bound)
        b = jax.random.uniform(kb, (1, fan_out), jnp.float32, -bound, bound)
        return w, b

    k1, k2, k3, k4 = jax.random.split(key, 4)
    w1, b1 = linear(k1, tab_in, 128)                     # tabular_fc[0]
    w2, b2 = linear(k2, 128, 64)                         # tabular_fc[3]
    comb = text_dim + vision_dim + 64
    w3, b3 = linear(k3, comb, 512)                       # fc[0]
    w4, b4 = linear(k4, 512, num_classes)                # fc[3]
    return {"w1": w1, "b1": b1, "w2": w2, "b2": b2,
            "w3": w3, "b3": b3, "w4": w4, "b4": b4}


def reference(text_emb, image_emb, tabular, params):
    """Un-folded f32 reference matching the PyTorch forward (eval mode)."""
    h1 = jnp.maximum(tabular @ params["w1"] + params["b1"], 0.0)
    tab_emb = h1 @ params["w2"] + params["b2"]
    combined = jnp.concatenate([text_emb, image_emb, tab_emb], axis=1)
    h2 = jnp.maximum(combined @ params["w3"] + params["b3"], 0.0)
    return h2 @ params["w4"] + params["b4"]


if __name__ == "__main__":
    # small shapes consistent with the module's forward
    batch = 2
    text_dim = 32        # stand-in for BERT hidden_size (768)
    vision_dim = 32      # stand-in for ViT hidden_size (768)
    tab_in = 10          # tabular_input_size
    num_classes = 10

    key = jax.random.PRNGKey(0)
    k_txt, k_img, k_tab, k_par = jax.random.split(key, 4)

    text_emb = jax.random.normal(k_txt, (batch, text_dim), jnp.float32)
    image_emb = jax.random.normal(k_img, (batch, vision_dim), jnp.float32)
    tabular = jax.random.uniform(k_tab, (batch, tab_in), jnp.float32)

    params = init_params(k_par, text_dim, vision_dim, tab_in, num_classes)
    weights, meta = prepare_kernel_params(params, text_dim, vision_dim)

    out = multimodal_head(text_emb, image_emb, tabular, weights, meta)
    out = jax.block_until_ready(out)

    ref = reference(text_emb, image_emb, tabular, params)
    assert out.shape == (batch, num_classes), out.shape
    # bf16 MXU operands + folded w2@w3_tab + bf16 output => small rounding vs f32 ref.
    assert jnp.allclose(out, ref, atol=5e-2, rtol=5e-2), jnp.max(jnp.abs(out - ref))

    print("KERNEL_OK")
</pallas_src>

<mosaic_0001>
module attributes {stable_mosaic.version = 11 : i64} {
  func.func @_fused_kernel(%arg0: i32, %arg1: memref<16x32xf32, #tpu.memory_space<vmem>>, %arg2: memref<16x32xf32, #tpu.memory_space<vmem>>, %arg3: memref<16x16xf32, #tpu.memory_space<vmem>>, %arg4: memref<16x128xbf16, #tpu.memory_space<vmem>>, %arg5: memref<1x128xf32, #tpu.memory_space<vmem>>, %arg6: memref<32x512xbf16, #tpu.memory_space<vmem>>, %arg7: memref<32x512xbf16, #tpu.memory_space<vmem>>, %arg8: memref<128x512xbf16, #tpu.memory_space<vmem>>, %arg9: memref<1x512xf32, #tpu.memory_space<vmem>>, %arg10: memref<512x128xbf16, #tpu.memory_space<vmem>>, %arg11: memref<1x128xf32, #tpu.memory_space<vmem>>, %arg12: memref<16x128xbf16, #tpu.memory_space<vmem>>) attributes {dimension_semantics = [#tpu.dimension_semantics<parallel>], iteration_bounds = array<i64: 1>, scalar_prefetch = 0 : i64, scratch_operands = 0 : i64, tpu.core_type = #tpu.core_type<tc>, window_params = [{transform_indices = @transform_0, window_bounds = array<i64: 16, 32>}, {transform_indices = @transform_1, window_bounds = array<i64: 16, 32>}, {transform_indices = @transform_2, window_bounds = array<i64: 16, 16>}, {pipeline_mode = #tpu.pipeline_mode<synchronous>, transform_indices = @transform_3, window_bounds = array<i64: 16, 128>}, {pipeline_mode = #tpu.pipeline_mode<synchronous>, transform_indices = @transform_4, window_bounds = array<i64: 1, 128>}, {pipeline_mode = #tpu.pipeline_mode<synchronous>, transform_indices = @transform_5, window_bounds = array<i64: 32, 512>}, {pipeline_mode = #tpu.pipeline_mode<synchronous>, transform_indices = @transform_6, window_bounds = array<i64: 32, 512>}, {pipeline_mode = #tpu.pipeline_mode<synchronous>, transform_indices = @transform_7, window_bounds = array<i64: 128, 512>}, {pipeline_mode = #tpu.pipeline_mode<synchronous>, transform_indices = @transform_8, window_bounds = array<i64: 1, 512>}, {pipeline_mode = #tpu.pipeline_mode<synchronous>, transform_indices = @transform_9, window_bounds = array<i64: 512, 128>}, {pipeline_mode = #tpu.pipeline_mode<synchronous>, transform_indices = @transform_10, window_bounds = array<i64: 1, 128>}, {transform_indices = @transform_11, window_bounds = array<i64: 16, 128>}]} {
    %c0 = arith.constant 0 : index
    %c0_0 = arith.constant 0 : index
    %0 = vector.load %arg3[%c0, %c0_0] : memref<16x16xf32, #tpu.memory_space<vmem>>, vector<16x16xf32>
    %1 = arith.truncf %0 : vector<16x16xf32> to vector<16x16xbf16>
    %c0_1 = arith.constant 0 : index
    %c0_2 = arith.constant 0 : index
    %2 = vector.load %arg4[%c0_1, %c0_2] : memref<16x128xbf16, #tpu.memory_space<vmem>>, vector<16x128xbf16>
    %cst = arith.constant dense<0.000000e+00> : vector<16x128xf32>
    %3 = tpu.matmul %1, %2, %cst {dimension_numbers = #tpu.dot_dimension_numbers<[1], [0], [0], [1], [0, 0, 1, 1], [], []>} : vector<16x16xbf16>, vector<16x128xbf16>, vector<16x128xf32> -> vector<16x128xf32>
    %c0_3 = arith.constant 0 : index
    %c0_4 = arith.constant 0 : index
    %4 = vector.load %arg5[%c0_3, %c0_4] : memref<1x128xf32, #tpu.memory_space<vmem>>, vector<1x128xf32>
    %5 = vector.broadcast %4 : vector<1x128xf32> to vector<16x128xf32>
    %6 = arith.addf %3, %5 : vector<16x128xf32>
    %cst_5 = arith.constant 0.000000e+00 : f32
    %7 = vector.broadcast %cst_5 : f32 to vector<16x128xf32>
    %8 = arith.maximumf %6, %7 : vector<16x128xf32>
    %c0_6 = arith.constant 0 : index
    %c0_7 = arith.constant 0 : index
    %9 = vector.load %arg1[%c0_6, %c0_7] : memref<16x32xf32, #tpu.memory_space<vmem>>, vector<16x32xf32>
    %10 = arith.truncf %9 : vector<16x32xf32> to vector<16x32xbf16>
    %c0_8 = arith.constant 0 : index
    %c0_9 = arith.constant 0 : index
    %11 = vector.load %arg6[%c0_8, %c0_9] : memref<32x512xbf16, #tpu.memory_space<vmem>>, vector<32x512xbf16>
    %cst_10 = arith.constant dense<0.000000e+00> : vector<16x512xf32>
    %12 = tpu.matmul %10, %11, %cst_10 {dimension_numbers = #tpu.dot_dimension_numbers<[1], [0], [0], [1], [0, 0, 1, 1], [], []>} : vector<16x32xbf16>, vector<32x512xbf16>, vector<16x512xf32> -> vector<16x512xf32>
    %c0_11 = arith.constant 0 : index
    %c0_12 = arith.constant 0 : index
    %13 = vector.load %arg2[%c0_11, %c0_12] : memref<16x32xf32, #tpu.memory_space<vmem>>, vector<16x32xf32>
    %14 = arith.truncf %13 : vector<16x32xf32> to vector<16x32xbf16>
    %c0_13 = arith.constant 0 : index
    %c0_14 = arith.constant 0 : index
    %15 = vector.load %arg7[%c0_13, %c0_14] : memref<32x512xbf16, #tpu.memory_space<vmem>>, vector<32x512xbf16>
    %cst_15 = arith.constant dense<0.000000e+00> : vector<16x512xf32>
    %16 = tpu.matmul %14, %15, %cst_15 {dimension_numbers = #tpu.dot_dimension_numbers<[1], [0], [0], [1], [0, 0, 1, 1], [], []>} : vector<16x32xbf16>, vector<32x512xbf16>, vector<16x512xf32> -> vector<16x512xf32>
    %17 = arith.addf %12, %16 : vector<16x512xf32>
    %18 = arith.truncf %8 : vector<16x128xf32> to vector<16x128xbf16>
    %c0_16 = arith.constant 0 : index
    %c0_17 = arith.constant 0 : index
    %19 = vector.load %arg8[%c0_16, %c0_17] : memref<128x512xbf16, #tpu.memory_space<vmem>>, vector<128x512xbf16>
    %cst_18 = arith.constant dense<0.000000e+00> : vector<16x512xf32>
    %20 = tpu.matmul %18, %19, %cst_18 {dimension_numbers = #tpu.dot_dimension_numbers<[1], [0], [0], [1], [0, 0, 1, 1], [], []>} : vector<16x128xbf16>, vector<128x512xbf16>, vector<16x512xf32> -> vector<16x512xf32>
    %21 = arith.addf %17, %20 : vector<16x512xf32>
    %c0_19 = arith.constant 0 : index
    %c0_20 = arith.constant 0 : index
    %22 = vector.load %arg9[%c0_19, %c0_20] : memref<1x512xf32, #tpu.memory_space<vmem>>, vector<1x512xf32>
    %23 = vector.broadcast %22 : vector<1x512xf32> to vector<16x512xf32>
    %24 = arith.addf %21, %23 : vector<16x512xf32>
    %cst_21 = arith.constant 0.000000e+00 : f32
    %25 = vector.broadcast %cst_21 : f32 to vector<16x512xf32>
    %26 = arith.maximumf %24, %25 : vector<16x512xf32>
    %27 = arith.truncf %26 : vector<16x512xf32> to vector<16x512xbf16>
    %c0_22 = arith.constant 0 : index
    %c0_23 = arith.constant 0 : index
    %28 = vector.load %arg10[%c0_22, %c0_23] : memref<512x128xbf16, #tpu.memory_space<vmem>>, vector<512x128xbf16>
    %cst_24 = arith.constant dense<0.000000e+00> : vector<16x128xf32>
    %29 = tpu.matmul %27, %28, %cst_24 {dimension_numbers = #tpu.dot_dimension_numbers<[1], [0], [0], [1], [0, 0, 1, 1], [], []>} : vector<16x512xbf16>, vector<512x128xbf16>, vector<16x128xf32> -> vector<16x128xf32>
    %c0_25 = arith.constant 0 : index
    %c0_26 = arith.constant 0 : index
    %30 = vector.load %arg11[%c0_25, %c0_26] : memref<1x128xf32, #tpu.memory_space<vmem>>, vector<1x128xf32>
    %31 = vector.broadcast %30 : vector<1x128xf32> to vector<16x128xf32>
    %32 = arith.addf %29, %31 : vector<16x128xf32>
    %33 = arith.truncf %32 : vector<16x128xf32> to vector<16x128xbf16>
    %c0_27 = arith.constant 0 : index
    %c0_28 = arith.constant 0 : index
    %34 = vector.load %arg12[%c0_27, %c0_28] : memref<16x128xbf16, #tpu.memory_space<vmem>>, vector<16x128xbf16>
    tpu.vector_store %arg12[%c0_27, %c0_28], %33 {strides = array<i32>} : memref<16x128xbf16, #tpu.memory_space<vmem>>, vector<16x128xbf16>,
    return
  }
  func.func @transform_0(%arg0: i32) -> (i32, i32) {
    %c0_i32 = arith.constant 0 : i32
    %c0_i32_0 = arith.constant 0 : i32
    return %arg0, %c0_i32 : i32, i32
  }
  func.func @transform_1(%arg0: i32) -> (i32, i32) {
    %c0_i32 = arith.constant 0 : i32
    %c0_i32_0 = arith.constant 0 : i32
    return %arg0, %c0_i32 : i32, i32
  }
  func.func @transform_2(%arg0: i32) -> (i32, i32) {
    %c0_i32 = arith.constant 0 : i32
    %c0_i32_0 = arith.constant 0 : i32
    return %arg0, %c0_i32 : i32, i32
  }
  func.func @transform_3(%arg0: i32) -> (i32, i32) {
    %c0_i32 = arith.constant 0 : i32
    %c0_i32_0 = arith.constant 0 : i32
    %c0_i32_1 = arith.constant 0 : i32
    return %c0_i32, %c0_i32_0 : i32, i32
  }
  func.func @transform_4(%arg0: i32) -> (i32, i32) {
    %c0_i32 = arith.constant 0 : i32
    %c0_i32_0 = arith.constant 0 : i32
    %c0_i32_1 = arith.constant 0 : i32
    return %c0_i32, %c0_i32_0 : i32, i32
  }
  func.func @transform_5(%arg0: i32) -> (i32, i32) {
    %c0_i32 = arith.constant 0 : i32
    %c0_i32_0 = arith.constant 0 : i32
    %c0_i32_1 = arith.constant 0 : i32
    return %c0_i32, %c0_i32_0 : i32, i32
  }
  func.func @transform_6(%arg0: i32) -> (i32, i32) {
    %c0_i32 = arith.constant 0 : i32
    %c0_i32_0 = arith.constant 0 : i32
    %c0_i32_1 = arith.constant 0 : i32
    return %c0_i32, %c0_i32_0 : i32, i32
  }
  func.func @transform_7(%arg0: i32) -> (i32, i32) {
    %c0_i32 = arith.constant 0 : i32
    %c0_i32_0 = arith.constant 0 : i32
    %c0_i32_1 = arith.constant 0 : i32
    return %c0_i32, %c0_i32_0 : i32, i32
  }
  func.func @transform_8(%arg0: i32) -> (i32, i32) {
    %c0_i32 = arith.constant 0 : i32
    %c0_i32_0 = arith.constant 0 : i32
    %c0_i32_1 = arith.constant 0 : i32
    return %c0_i32, %c0_i32_0 : i32, i32
  }
  func.func @transform_9(%arg0: i32) -> (i32, i32) {
    %c0_i32 = arith.constant 0 : i32
    %c0_i32_0 = arith.constant 0 : i32
    %c0_i32_1 = arith.constant 0 : i32
    return %c0_i32, %c0_i32_0 : i32, i32
  }
  func.func @transform_10(%arg0: i32) -> (i32, i32) {
    %c0_i32 = arith.constant 0 : i32
    %c0_i32_0 = arith.constant 0 : i32
    %c0_i32_1 = arith.constant 0 : i32
    return %c0_i32, %c0_i32_0 : i32, i32
  }
  func.func @transform_11(%arg0: i32) -> (i32, i32) {
    %c0_i32 = arith.constant 0 : i32
    %c0_i32_0 = arith.constant 0 : i32
    return %arg0, %c0_i32 : i32, i32
  }
}

</mosaic_0001>

<bundles_post_ra>
// kernel: _multimodal_head_impl.1
= control target key start
LH: loop header
LB: loop body
LE: loop exit
PB: predicated region body
PF: predicated region fallthrough
CT: control target
= control target key end

     0   :  { %16 = vsyncpa [#allocation3], 0  ;;  %s1686_s0 = inlined_call_operand.vmem [shape: f32[16,32], index: 0, kind: input, shape index: {}]   ;;  %s1687_s1 = inlined_call_operand.vmem [shape: f32[16,32], index: 1, kind: input, shape index: {}]   ;;  %s1688_s2 = inlined_call_operand.vmem [shape: f32[16,16], index: 2, kind: input, shape index: {}]   ;;  %s1689_s3 = inlined_call_operand.vmem [shape: bf16[16,128], index: 3, kind: input, shape index: {}]   ;;  %s1690_s4 = inlined_call_operand.vmem [shape: f32[1,128], index: 4, kind: input, shape index: {}]   ;;  %s1691_s5 = inlined_call_operand.hbm [shape: bf16[32,512], index: 5, kind: input, shape index: {}]   ;;  %s1692_s6 = inlined_call_operand.hbm [shape: bf16[32,512], index: 6, kind: input, shape index: {}]   ;;  %s1693_s7 = inlined_call_operand.hbm [shape: bf16[128,512], index: 7, kind: input, shape index: {}]   ;;  %s1694_s8 = inlined_call_operand.vmem [shape: f32[1,512], index: 8, kind: input, shape index: {}]   ;;  %s1695_s9 = inlined_call_operand.hbm [shape: bf16[512,128], index: 9, kind: input, shape index: {}]   ;;  %s1696_s10 = inlined_call_operand.vmem [shape: f32[1,128], index: 10, kind: input, shape index: {}]   ;;  %s1697_s11 = inlined_call_operand.hbm [shape: bf16[16,128], index: 11, kind: output, shape index: {}]  }
   0x1   :  { %17 = vsyncpa [#allocation6], 0 }
   0x2   :  { %18 = vsyncpa [#allocation9], 0 }
   0x3   :  { %19 = vsyncpa [#allocation4], 0  ;;  %s47_s19 = sshll.u32 %s1692_s6, 4  ;;  %s1545_s20 = smov [#allocation5]   ;;  %s48_s19 = int_to_ptr.hbm [resolvable:$true] %s47_s19 }
   0x4   :  { %s49_s21 = sshll.u32 %s1545_s20, 4  ;;  %s34_s24 = sshll.u32 %s1691_s5, 4  ;;  %s50_s21 = int_to_ptr.vmem [resolvable:$true] %s49_s21  ;;  %s35_s24 = int_to_ptr.hbm [resolvable:$true] %s34_s24 }
   0x5   :  { %s1546_s25 = smov 256   ;;  %s1547_s26 = smov 16  }
   0x6   :  { %55 = dma.hbm_to_vmem [thread:$0]  %s48_s19, 1024, %s50_s21, [#allocation6], %s1546_s25, %s1546_s25, %s1547_s26  }
   0x7   :  { %s1548_s27 = smov [#allocation2]   ;;  %s60_s12 = sshll.u32 %s1693_s7, 4  ;;  %s61_s12 = int_to_ptr.hbm [resolvable:$true] %s60_s12 }
   0x8   :  { %s36_s28 = sshll.u32 %s1548_s27, 4  ;;  %s75_s14 = sshll.u32 %s1695_s9, 4  ;;  %s37_s28 = int_to_ptr.vmem [resolvable:$true] %s36_s28  ;;  %s76_s14 = int_to_ptr.hbm [resolvable:$true] %s75_s14 }
   0x9   :  { %42 = dma.hbm_to_vmem [thread:$0]  %s35_s24, 1024, %s37_s28, [#allocation3], %s1546_s25, %s1546_s25, %s1547_s26  }
   0xa   :  { %s1549_s15 = smov [#allocation7]   ;;  %s1550_s5 = smov [#allocation8]  }
   0xb   :  { %s62_s16 = sshll.u32 %s1549_s15, 4  ;;  %s77_s17 = sshll.u32 %s1550_s5, 4  ;;  %s63_s16 = int_to_ptr.vmem [resolvable:$true] %s62_s16  ;;  %s78_s17 = int_to_ptr.vmem [resolvable:$true] %s77_s17 }
   0xc   :  { %68 = dma.hbm_to_vmem [thread:$0]  %s61_s12, 4096, %s63_s16, [#allocation6], %s1546_s25, %s1546_s25, %s1547_s26  }
   0xd   :  { %s1551_s18 = smov 64   ;;  %s1552_s19 = smov 4  }
   0xe   :  { %83 = dma.hbm_to_vmem [thread:$0]  %s76_s14, 4096, %s78_s17, [#allocation9], %s1551_s18, %s1551_s18, %s1552_s19  }
   0xf   :  { %1537 = dma.done.wait [#allocation3], 1024  }
  0x10   :  { %1538 = vsyncadd [#allocation3], 4294966272 }
  0x11   :  { %1539 = dma.done.wait [#allocation6], 5120  }
  0x12   :  { %1540 = vsyncadd [#allocation6], 4294962176 }
  0x13   :  { %1541 = dma.done.wait [#allocation9], 4096  }
  0x14   :  { %1542 = vsyncadd [#allocation9], 4294963200  ;;  %v1320_v0 = vld [vmem:[%s1689_s3] sm:$0xff]  ;;  %v104_v2 = vld [vmem:[%s1688_s2 + $0x8] sm:$0xff]  ;;  %vm118_vm0 = vcmask 130048   ;;  %vm200_vm1 = vcmask 261120  }
  0x15   :  { %v103_v1 = vld [vmem:[%s1688_s2] sm:$0xff]  ;;  %v1012_v5 = vld [vmem:[#allocation5 + $0x30] sm:$0xf0]  ;;  %v1018_v6 = vld [vmem:[#allocation5 + $0x28] sm:$0xf]  ;;  %129 = vmatpush.bf16.msra.mxu0 %v1320_v0  ;;  %s1553_s6 = smov [#allocation10]  }
  0x16   :  { %v105_v3 = vpack.c.bf16 %v104_v2, %v103_v1  ;;  %v1333_v4 = vld [vmem:[#allocation5 + $0x24] sm:$0xf]  ;;  %v1336_v8 = vld [vmem:[#allocation5 + $0x34] sm:$0xf0]  ;;  %v996_v10 = vld [vmem:[#allocation5 + $0x10] sm:$0xf0] }
  0x17   :  { %v1015_v7 = vor.u32 %v1333_v4, %v1012_v5  ;;  %v1329_v9 = vld [vmem:[#allocation5 + $0x4] sm:$0xf]  ;;  %v1019_v11 = vor.u32 %v1336_v8, %v1018_v6  ;;  %v1002_v12 = vld [vmem:[#allocation5 + $0x8] sm:$0xf]  ;;  %v1332_v13 = vld [vmem:[#allocation5 + $0x14] sm:$0xf0] }
  0x18   :  { %v149_v14 = vld [vmem:[%s1687_s1] sm:$0xff]  ;;  %v999_v15 = vor.u32 %v1329_v9, %v996_v10  ;;  %v150_v16 = vld [vmem:[%s1687_s1 + $0x8] sm:$0xff]  ;;  %v1335_v18 = vld [vmem:[#allocation5 + $0x2c] sm:$0xf0]  ;;  %991 = vmatmul.msk.bf16.vlgmr.msra.gmra.mxu0 %vm118_vm0, %v105_v3  ;;  %v1003_v19 = vor.u32 %v1332_v13, %v1002_v12  ;;  %s970_s13 = sshll.u32 %s1553_s6, 4  ;;  %s972_s16 = sshll.u32 %s1697_s11, 4  ;;  %s971_s13 = int_to_ptr.vmem [resolvable:$true] %s970_s13  ;;  %s973_s16 = int_to_ptr.hbm [resolvable:$true] %s972_s16 }
  0x19   :  { %224 = vmatpush.bf16.msra.mxu2 %v1015_v7  ;;  %v1010_v17 = vld [vmem:[#allocation5 + $0x20] sm:$0xf]  ;;  %238 = vmatpush.bf16.msra.mxu3 %v1019_v11  ;;  %v1331_v22 = vld [vmem:[#allocation5 + $0xc] sm:$0xf0]  ;;  %v1334_v23 = vld [vmem:[#allocation5 + $0x2c] sm:$0xf]  ;;  %v1645_v27 = vpack.c.bf16 %v150_v16, %v149_v14 }
  0x1a   :  { %v1011_v20 = vor.u32 %v1335_v18, %v1010_v17  ;;  %v994_v21 = vld [vmem:[#allocation5] sm:$0xf]  ;;  %v1020_v24 = vld [vmem:[#allocation5 + $0x38] sm:$0xf0]  ;;  %v1325_v25 = vld [vmem:[#allocation2 + $0x24] sm:$0xf] }
  0x1b   :  { %v1048_v26 = vld [vmem:[#allocation2 + $0x30] sm:$0xf0]  ;;  %v995_v28 = vor.u32 %v1331_v22, %v994_v21  ;;  %v1023_v29 = vor.u32 %v1334_v23, %v1020_v24  ;;  %v1054_v31 = vld [vmem:[#allocation2 + $0x28] sm:$0xf]  ;;  %v1328_v32 = vld [vmem:[#allocation2 + $0x34] sm:$0xf0] }
  0x1c   :  { %210 = vmatpush.bf16.msra.mxu1 %v1011_v20  ;;  %v1051_v30 = vor.u32 %v1325_v25, %v1048_v26  ;;  %v1330_v33 = vld [vmem:[#allocation5 + $0xc] sm:$0xf]  ;;  %v1055_v34 = vor.u32 %v1328_v32, %v1054_v31  ;;  %v1004_v35 = vld [vmem:[#allocation5 + $0x18] sm:$0xf0]  ;;  %v1321_v36 = vld [vmem:[#allocation2 + $0x4] sm:$0xf] }
  0x1d   :  { %225 = vmatpush.bf16.msra.mxu2 %v999_v15  ;;  %v1032_v37 = vld [vmem:[#allocation2 + $0x10] sm:$0xf0]  ;;  %239 = vmatpush.bf16.msra.mxu3 %v1003_v19  ;;  %v1007_v38 = vor.u32 %v1330_v33, %v1004_v35  ;;  %v1038_v39 = vld [vmem:[#allocation2 + $0x8] sm:$0xf]  ;;  %v1324_v40 = vld [vmem:[#allocation2 + $0x14] sm:$0xf0] }
  0x1e   :  { %252 = vmatpush.bf16.msrb.mxu0 %v1023_v29  ;;  %v1035_v41 = vor.u32 %v1321_v36, %v1032_v37  ;;  %v1046_v42 = vld [vmem:[#allocation2 + $0x20] sm:$0xf]  ;;  %v1327_v43 = vld [vmem:[#allocation2 + $0x2c] sm:$0xf0]  ;;  %v1039_v44 = vor.u32 %v1324_v40, %v1038_v39  ;;  %v1326_v46 = vld [vmem:[#allocation2 + $0x2c] sm:$0xf] }
  0x1f   :  { %v1047_v45 = vor.u32 %v1327_v43, %v1046_v42  ;;  %v1056_v47 = vld [vmem:[#allocation2 + $0x38] sm:$0xf0]  ;;  %v1030_v48 = vld [vmem:[#allocation2] sm:$0xf]  ;;  %v1323_v50 = vld [vmem:[#allocation2 + $0xc] sm:$0xf0] }
  0x20   :  { %1025 = vmatmul.msk.bf16.vlgmr.msra.gmra.mxu2 %vm200_vm1, %v1645_v27  ;;  %211 = vmatpush.bf16.msra.mxu1 %v995_v28  ;;  %v1059_v49 = vor.u32 %v1326_v46, %v1056_v47  ;;  %v1322_v51 = vld [vmem:[#allocation2 + $0xc] sm:$0xf]  ;;  %v1040_v52 = vld [vmem:[#allocation2 + $0x18] sm:$0xf0]  ;;  %v1031_v53 = vor.u32 %v1323_v50, %v1030_v48  ;;  %v1178_v54 = vld [vmem:[#allocation7 + $0xe0] sm:$0xf] }
  0x21   :  { %323 = vmatpush.bf16.msrb.mxu2 %v1051_v30  ;;  %337 = vmatpush.bf16.msrb.mxu3 %v1055_v34  ;;  %v1367_v55 = vld [vmem:[#allocation7 + $0xec] sm:$0xf0]  ;;  %v1365_v56 = vld [vmem:[#allocation7 + $0xe4] sm:$0xf]  ;;  %v1180_v58 = vld [vmem:[#allocation7 + $0xf0] sm:$0xf0]  ;;  %v1043_v61 = vor.u32 %v1322_v51, %v1040_v52 }
  0x22   :  { %1026 = vmatmul.msk.bf16.vlgmr.msra.gmra.mxu3 %vm200_vm1, %v1645_v27  ;;  %253 = vmatpush.bf16.msrb.mxu0 %v1007_v38  ;;  %v1179_v57 = vor.u32 %v1367_v55, %v1178_v54  ;;  %v1186_v59 = vld [vmem:[#allocation7 + $0xe8] sm:$0xf]  ;;  %v1368_v60 = vld [vmem:[#allocation7 + $0xf4] sm:$0xf0]  ;;  %v1183_v62 = vor.u32 %v1365_v56, %v1180_v58  ;;  %v1366_v0 = vld [vmem:[#allocation7 + $0xec] sm:$0xf] }
  0x23   :  { %1024 = vmatmul.msk.bf16.vlgmr.msra.gmra.mxu1 %vm200_vm1, %v1645_v27  ;;  %v1187_v63 = vor.u32 %v1368_v60, %v1186_v59  ;;  %v1188_v1 = vld [vmem:[#allocation7 + $0xf8] sm:$0xf0]  ;;  %v1162_v2 = vld [vmem:[#allocation7 + $0xc0] sm:$0xf]  ;;  %v1363_v3 = vld [vmem:[#allocation7 + $0xcc] sm:$0xf0] }
  0x24   :  { %309 = vmatpush.bf16.msrb.mxu1 %v1047_v45  ;;  %v1361_v4 = vld [vmem:[#allocation7 + $0xc4] sm:$0xf]  ;;  %v1164_v5 = vld [vmem:[#allocation7 + $0xd0] sm:$0xf0]  ;;  %v1170_v7 = vld [vmem:[#allocation7 + $0xc8] sm:$0xf]  ;;  %v1191_v10 = vor.u32 %v1366_v0, %v1188_v1  ;;  %v1163_v11 = vor.u32 %v1363_v3, %v1162_v2 }
  0x25   :  { %324 = vmatpush.bf16.msrb.mxu2 %v1035_v41  ;;  %338 = vmatpush.bf16.msrb.mxu3 %v1039_v44  ;;  %v1167_v6 = vor.u32 %v1361_v4, %v1164_v5  ;;  %v1364_v8 = vld [vmem:[#allocation7 + $0xd4] sm:$0xf0]  ;;  %v138_v9 = vld [vmem:[%s1686_s0] sm:$0xff]  ;;  %v1362_v12 = vld [vmem:[#allocation7 + $0xcc] sm:$0xf] }
  0x26   :  { %351 = vmatpush.bf16.msra.mxu0 %v1059_v49  ;;  %v1172_v13 = vld [vmem:[#allocation7 + $0xd8] sm:$0xf0]  ;;  %v1146_v14 = vld [vmem:[#allocation7 + $0xa0] sm:$0xf]  ;;  %v1171_v15 = vor.u32 %v1364_v8, %v1170_v7  ;;  %v1359_v16 = vld [vmem:[#allocation7 + $0xac] sm:$0xf0] }
  0x27   :  { %v1357_v17 = vld [vmem:[#allocation7 + $0xa4] sm:$0xf]  ;;  %v1148_v18 = vld [vmem:[#allocation7 + $0xb0] sm:$0xf0]  ;;  %v139_v19 = vld [vmem:[%s1686_s0 + $0x8] sm:$0xff]  ;;  %v1175_v24 = vor.u32 %v1362_v12, %v1172_v13  ;;  %v1147_v25 = vor.u32 %v1359_v16, %v1146_v14 }
  0x28   :  { %310 = vmatpush.bf16.msrb.mxu1 %v1031_v53  ;;  %v1154_v20 = vld [vmem:[#allocation7 + $0xa8] sm:$0xf]  ;;  %v1360_v21 = vld [vmem:[#allocation7 + $0xb4] sm:$0xf0]  ;;  %1027 = vmatmul.msk.bf16.vlgmr.msrb.gmra.mxu0 %vm200_vm1, %v1645_v27  ;;  %v1151_v22 = vor.u32 %v1357_v17, %v1148_v18  ;;  %v1358_v23 = vld [vmem:[#allocation7 + $0xac] sm:$0xf]  ;;  %v140_v30 = vpack.c.bf16 %v139_v19, %v138_v9 }
  0x29   :  { %566 = vmatpush.bf16.msra.mxu2 %v1183_v62  ;;  %580 = vmatpush.bf16.msra.mxu3 %v1187_v63  ;;  %v1156_v26 = vld [vmem:[#allocation7 + $0xb8] sm:$0xf0]  ;;  %v1353_v28 = vld [vmem:[#allocation7 + $0x84] sm:$0xf]  ;;  %v1132_v29 = vld [vmem:[#allocation7 + $0x90] sm:$0xf0]  ;;  %v1155_v31 = vor.u32 %v1360_v21, %v1154_v20 }
  0x2a   :  { %352 = vmatpush.bf16.msra.mxu0 %v1043_v61  ;;  %v1130_v32 = vld [vmem:[#allocation7 + $0x80] sm:$0xf]  ;;  %v1355_v33 = vld [vmem:[#allocation7 + $0x8c] sm:$0xf0]  ;;  %v1138_v34 = vld [vmem:[#allocation7 + $0x88] sm:$0xf]  ;;  %v1135_v36 = vor.u32 %v1353_v28, %v1132_v29  ;;  %v1159_v27 = vor.u32 %v1358_v23, %v1156_v26 }
  0x2b   :  { %v1356_v35 = vld [vmem:[#allocation7 + $0x94] sm:$0xf0]  ;;  %v1131_v37 = vor.u32 %v1355_v33, %v1130_v32  ;;  %v1354_v39 = vld [vmem:[#allocation7 + $0x8c] sm:$0xf]  ;;  %v1140_v40 = vld [vmem:[#allocation7 + $0x98] sm:$0xf0] }
  0x2c   :  { %552 = vmatpush.bf16.msra.mxu1 %v1179_v57  ;;  %v1139_v38 = vor.u32 %v1356_v35, %v1138_v34  ;;  %v1143_v41 = vor.u32 %v1354_v39, %v1140_v40  ;;  %v1114_v42 = vld [vmem:[#allocation7 + $0x60] sm:$0xf]  ;;  %v1351_v43 = vld [vmem:[#allocation7 + $0x6c] sm:$0xf0]  ;;  %v1349_v44 = vld [vmem:[#allocation7 + $0x64] sm:$0xf] }
  0x2d   :  { %567 = vmatpush.bf16.msra.mxu2 %v1167_v6  ;;  %581 = vmatpush.bf16.msra.mxu3 %v1171_v15  ;;  %v1115_v45 = vor.u32 %v1351_v43, %v1114_v42  ;;  %v1116_v46 = vld [vmem:[#allocation7 + $0x70] sm:$0xf0]  ;;  %v1122_v47 = vld [vmem:[#allocation7 + $0x68] sm:$0xf]  ;;  %v1352_v48 = vld [vmem:[#allocation7 + $0x74] sm:$0xf0] }
  0x2e   :  { %594 = vmatpush.bf16.msrb.mxu0 %v1191_v10  ;;  %v1119_v49 = vor.u32 %v1349_v44, %v1116_v46  ;;  %v1123_v50 = vor.u32 %v1352_v48, %v1122_v47  ;;  %v1350_v51 = vld [vmem:[#allocation7 + $0x6c] sm:$0xf]  ;;  %v1124_v52 = vld [vmem:[#allocation7 + $0x78] sm:$0xf0]  ;;  %v1098_v54 = vld [vmem:[#allocation7 + $0x40] sm:$0xf] }
  0x2f   :  { %v1127_v53 = vor.u32 %v1350_v51, %v1124_v52  ;;  %v1347_v55 = vld [vmem:[#allocation7 + $0x4c] sm:$0xf0]  ;;  %v1345_v56 = vld [vmem:[#allocation7 + $0x44] sm:$0xf]  ;;  %v1100_v58 = vld [vmem:[#allocation7 + $0x50] sm:$0xf0] }
  0x30   :  { %553 = vmatpush.bf16.msra.mxu1 %v1163_v11  ;;  %1061 = vmatmul.msk.bf16.vlgmr.msrb.gmra.mxu2 %vm200_vm1, %v140_v30  ;;  %v1099_v57 = vor.u32 %v1347_v55, %v1098_v54  ;;  %v1106_v59 = vld [vmem:[#allocation7 + $0x48] sm:$0xf]  ;;  %v1348_v60 = vld [vmem:[#allocation7 + $0x54] sm:$0xf0]  ;;  %v1103_v61 = vor.u32 %v1345_v56, %v1100_v58  ;;  %v1346_v63 = vld [vmem:[#allocation7 + $0x4c] sm:$0xf] }
  0x31   :  { %568 = vmatpush.bf16.msra.mxu2 %v1151_v22  ;;  %582 = vmatpush.bf16.msra.mxu3 %v1155_v31  ;;  %v1107_v62 = vor.u32 %v1348_v60, %v1106_v59  ;;  %v1108_v0 = vld [vmem:[#allocation7 + $0x58] sm:$0xf0]  ;;  %v1082_v2 = vld [vmem:[#allocation7 + $0x20] sm:$0xf]  ;;  %v1343_v3 = vld [vmem:[#allocation7 + $0x2c] sm:$0xf0] }
  0x32   :  { %595 = vmatpush.bf16.msrb.mxu0 %v1175_v24  ;;  %1062 = vmatmul.msk.bf16.vlgmr.msrb.gmra.mxu3 %vm200_vm1, %v140_v30  ;;  %v1111_v1 = vor.u32 %v1346_v63, %v1108_v0  ;;  %v1341_v4 = vld [vmem:[#allocation7 + $0x24] sm:$0xf]  ;;  %v1083_v5 = vor.u32 %v1343_v3, %v1082_v2  ;;  %v1084_v6 = vld [vmem:[#allocation7 + $0x30] sm:$0xf0]  ;;  %v1090_v7 = vld [vmem:[#allocation7 + $0x28] sm:$0xf] }
  0x33   :  { %1060 = vmatmul.msk.bf16.vlgmr.msrb.gmra.mxu1 %vm200_vm1, %v140_v30  ;;  %v1344_v8 = vld [vmem:[#allocation7 + $0x34] sm:$0xf0]  ;;  %v1087_v9 = vor.u32 %v1341_v4, %v1084_v6  ;;  %v1342_v11 = vld [vmem:[#allocation7 + $0x2c] sm:$0xf]  ;;  %v1092_v12 = vld [vmem:[#allocation7 + $0x38] sm:$0xf0] }
  0x34   :  { %554 = vmatpush.bf16.msra.mxu1 %v1147_v25  ;;  %v1091_v10 = vor.u32 %v1344_v8, %v1090_v7  ;;  %v1095_v13 = vor.u32 %v1342_v11, %v1092_v12  ;;  %v1066_v14 = vld [vmem:[#allocation7] sm:$0xf]  ;;  %v1339_v15 = vld [vmem:[#allocation7 + $0xc] sm:$0xf0]  ;;  %v1337_v16 = vld [vmem:[#allocation7 + $0x4] sm:$0xf] }
  0x35   :  { %569 = vmatpush.bf16.msra.mxu2 %v1135_v36  ;;  %583 = vmatpush.bf16.msra.mxu3 %v1139_v38  ;;  %v1067_v17 = vor.u32 %v1339_v15, %v1066_v14  ;;  %v1068_v18 = vld [vmem:[#allocation7 + $0x10] sm:$0xf0]  ;;  %v1074_v19 = vld [vmem:[#allocation7 + $0x8] sm:$0xf]  ;;  %v1340_v20 = vld [vmem:[#allocation7 + $0x14] sm:$0xf0] }
  0x36   :  { %596 = vmatpush.bf16.msrb.mxu0 %v1159_v27  ;;  %v1071_v21 = vor.u32 %v1337_v16, %v1068_v18  ;;  %v1075_v22 = vor.u32 %v1340_v20, %v1074_v19  ;;  %v1338_v23 = vld [vmem:[#allocation7 + $0xc] sm:$0xf]  ;;  %v1076_v24 = vld [vmem:[#allocation7 + $0x18] sm:$0xf0]  ;;  %v1415_v28 = vld [vmem:[%s1690_s4] ss:$0 sm:$0xff] }
  0x37   :  { %v1079_v25 = vor.u32 %v1338_v23, %v1076_v24  ;;  %v1376_v32 = vld [vmem:[#allocation8 + $0x38] sm:$0xff]  ;;  %v1375_v38 = vld [vmem:[#allocation8 + $0x30] sm:$0xff]  ;;  %v1374_v42 = vld [vmem:[#allocation8 + $0x28] sm:$0xff] }
  0x38   :  { %555 = vmatpush.bf16.msra.mxu1 %v1131_v37  ;;  %1063 = vmatmul.msk.bf16.vlgmr.msra.gmra.mxu0 %vm200_vm1, %v140_v30  ;;  %v1400_v33 = vld [vmem:[#allocation8 + $0xf8] sm:$0xff]  ;;  %v1399_v39 = vld [vmem:[#allocation8 + $0xf0] sm:$0xff]  ;;  %v1398_v43 = vld [vmem:[#allocation8 + $0xe8] sm:$0xff] }
  0x39   :  { %570 = vmatpush.bf16.msra.mxu2 %v1119_v49  ;;  %584 = vmatpush.bf16.msra.mxu3 %v1123_v50  ;;  %v1384_v34 = vld [vmem:[#allocation8 + $0x78] sm:$0xff]  ;;  %v1383_v40 = vld [vmem:[#allocation8 + $0x70] sm:$0xff]  ;;  %v1373_v44 = vld [vmem:[#allocation8 + $0x20] sm:$0xff] }
  0x3a   :  { %597 = vmatpush.bf16.msrb.mxu0 %v1143_v41  ;;  %v1392_v35 = vld [vmem:[#allocation8 + $0xb8] sm:$0xff]  ;;  %v1391_v41 = vld [vmem:[#allocation8 + $0xb0] sm:$0xff]  ;;  %v1382_v48 = vld [vmem:[#allocation8 + $0x68] sm:$0xff] }
  0x3b   :  { %v1390_v49 = vld [vmem:[#allocation8 + $0xa8] sm:$0xff]  ;;  %v1372_v52 = vld [vmem:[#allocation8 + $0x18] sm:$0xff]  ;;  %v1381_v54 = vld [vmem:[#allocation8 + $0x60] sm:$0xff] }
  0x3c   :  { %556 = vmatpush.bf16.msra.mxu1 %v1115_v45  ;;  %v1397_v45 = vld [vmem:[#allocation8 + $0xe0] sm:$0xff]  ;;  %v1371_v58 = vld [vmem:[#allocation8 + $0x10] sm:$0xff]  ;;  %v1380_v60 = vld [vmem:[#allocation8 + $0x58] sm:$0xff] }
  0x3d   :  { %571 = vmatpush.bf16.msra.mxu2 %v1103_v61  ;;  %585 = vmatpush.bf16.msra.mxu3 %v1107_v62  ;;  %v1389_v55 = vld [vmem:[#allocation8 + $0xa0] sm:$0xff]  ;;  %v1395_v59 = vld [vmem:[#allocation8 + $0xd0] sm:$0xff]  ;;  %v1388_v61 = vld [vmem:[#allocation8 + $0x98] sm:$0xff] }
  0x3e   :  { %598 = vmatpush.bf16.msrb.mxu0 %v1127_v53  ;;  %v1396_v53 = vld [vmem:[#allocation8 + $0xd8] sm:$0xff]  ;;  %v1370_v62 = vld [vmem:[#allocation8 + $0x8] sm:$0xff]  ;;  %v1379_v2 = vld [vmem:[#allocation8 + $0x50] sm:$0xff] }
  0x3f   :  { %v1394_v63 = vld [vmem:[#allocation8 + $0xc8] sm:$0xff]  ;;  %v1387_v3 = vld [vmem:[#allocation8 + $0x90] sm:$0xff]  ;;  %v1369_v4 = vld [vmem:[#allocation8] sm:$0xff] }
  0x40   :  { %557 = vmatpush.bf16.msra.mxu1 %v1099_v57  ;;  %v1378_v8 = vld [vmem:[#allocation8 + $0x48] sm:$0xff]  ;;  %v1385_v11 = vld [vmem:[#allocation8 + $0x80] sm:$0xff] }
  0x41   :  { %572 = vmatpush.bf16.msra.mxu2 %v1087_v9  ;;  %586 = vmatpush.bf16.msra.mxu3 %v1091_v10  ;;  %v1386_v9 = vld [vmem:[#allocation8 + $0x88] sm:$0xff]  ;;  %v1377_v10 = vld [vmem:[#allocation8 + $0x40] sm:$0xff] }
  0x42   :  { %599 = vmatpush.bf16.msrb.mxu0 %v1111_v1  ;;  %v616_v20 = vld [vmem:[%s1694_s8] sm:$0xf] }
  0x43   :  { %v618_v24 = vperm.slane %v616_v20, 0 }
  0x44   :  { %558 = vmatpush.bf16.msra.mxu1 %v1083_v5  ;;  %v1393_v5 = vld [vmem:[#allocation8 + $0xc0] sm:$0xff] }
  0x45   :  { %573 = vmatpush.bf16.msra.mxu2 %v1071_v21  ;;  %587 = vmatpush.bf16.msra.mxu3 %v1075_v22 }
  0x46   :  { %600 = vmatpush.bf16.msrb.mxu0 %v1095_v13 }
  0x48   :  { %559 = vmatpush.bf16.msra.mxu1 %v1067_v17 }
  0x49   :  { %920 = vmatpush.bf16.msrb.mxu2 %v1384_v34  ;;  %934 = vmatpush.bf16.msrb.mxu3 %v1392_v35 }
  0x4a   :  { %601 = vmatpush.bf16.msrb.mxu0 %v1079_v25 }
  0x4c   :  { %906 = vmatpush.bf16.msrb.mxu1 %v1376_v32 }
  0x4d   :  { %921 = vmatpush.bf16.msrb.mxu2 %v1383_v40  ;;  %935 = vmatpush.bf16.msrb.mxu3 %v1391_v41  ;;  %v619_v40 = vperm.slane %v616_v20, 1 }
  0x4e   :  { %948 = vmatpush.bf16.msra.mxu0 %v1400_v33 }
  0x50   :  { %907 = vmatpush.bf16.msrb.mxu1 %v1375_v38 }
  0x51   :  { %922 = vmatpush.bf16.msrb.mxu2 %v1382_v48  ;;  %936 = vmatpush.bf16.msrb.mxu3 %v1390_v49 }
  0x52   :  { %949 = vmatpush.bf16.msra.mxu0 %v1399_v39 }
  0x54   :  { %908 = vmatpush.bf16.msrb.mxu1 %v1374_v42 }
  0x55   :  { %923 = vmatpush.bf16.msrb.mxu2 %v1381_v54  ;;  %937 = vmatpush.bf16.msrb.mxu3 %v1389_v55 }
  0x56   :  { %950 = vmatpush.bf16.msra.mxu0 %v1398_v43  ;;  %v620_v43 = vperm.slane %v616_v20, 2 }
  0x58   :  { %909 = vmatpush.bf16.msrb.mxu1 %v1373_v44 }
  0x59   :  { %924 = vmatpush.bf16.msrb.mxu2 %v1380_v60  ;;  %938 = vmatpush.bf16.msrb.mxu3 %v1388_v61 }
  0x5a   :  { %951 = vmatpush.bf16.msra.mxu0 %v1397_v45 }
  0x5c   :  { %910 = vmatpush.bf16.msrb.mxu1 %v1372_v52 }
  0x5d   :  { %925 = vmatpush.bf16.msrb.mxu2 %v1379_v2  ;;  %939 = vmatpush.bf16.msrb.mxu3 %v1387_v3 }
  0x5e   :  { %952 = vmatpush.bf16.msra.mxu0 %v1396_v53 }
  0x60   :  { %911 = vmatpush.bf16.msrb.mxu1 %v1371_v58 }
  0x61   :  { %926 = vmatpush.bf16.msrb.mxu2 %v1378_v8  ;;  %940 = vmatpush.bf16.msrb.mxu3 %v1386_v9 }
  0x62   :  { %953 = vmatpush.bf16.msra.mxu0 %v1395_v59 }
  0x64   :  { %912 = vmatpush.bf16.msrb.mxu1 %v1370_v62 }
  0x65   :  { %927 = vmatpush.bf16.msrb.mxu2 %v1377_v10  ;;  %941 = vmatpush.bf16.msrb.mxu3 %v1385_v11 }
  0x66   :  { %954 = vmatpush.bf16.msra.mxu0 %v1394_v63 }
  0x68   :  { %913 = vmatpush.bf16.msrb.mxu1 %v1369_v4  ;;  %v1416_v4 = vld [vmem:[%s1696_s10] ss:$0 sm:$0xff] }
  0x6a   :  { %955 = vmatpush.bf16.msra.mxu0 %v1393_v5 }
  0x95   :  { %v131_v26 = vpop.f32.mrf.mxu0 }
  0x96   :  { %v132_v29 = vadd.f32 %v1415_v28, %v131_v26  ;;  %v621_v26 = vperm.slane %v616_v20, 3 }
  0x98   :  { %v136_v36 = vmax.f32 %v132_v29, 0.0 }
  0x9d   :  { %v133_v30 = vpop.f32.mrf.mxu0 }
  0x9e   :  { %v134_v31 = vadd.f32 %v1415_v28, %v133_v30 }
  0xa0   :  { %v137_v27 = vmax.f32 %v134_v31, 0.0  ;;  %v213_v46 = vpop.f32.mrf.mxu1 }
  0xa2   :  { %v359_v37 = vpack.c.bf16 %v137_v27, %v136_v36 }
  0xa3   :  { %v1668_v50 = vpop.f32.mrf.mxu2 }
  0xa4   :  { %560 = vmatmul.bf16.vlgmr.msra.gmra.mxu1 %v359_v37  ;;  %574 = vmatmul.bf16.vlgmr.msra.gmra.mxu2 %v359_v37 }
  0xa5   :  { %588 = vmatmul.bf16.vlgmr.msra.gmra.mxu3 %v359_v37  ;;  %602 = vmatmul.bf16.vlgmr.msrb.gmra.mxu0 %v359_v37  ;;  %v255_v47 = vpop.f32.mrf.mxu0  ;;  %v1670_v51 = vpop.f32.mrf.mxu3 }
  0xa8   :  { %v215_v56 = vpop.f32.mrf.mxu1 }
  0xab   :  { %v229_v0 = vpop.f32.mrf.mxu2 }
  0xad   :  { %v257_v57 = vpop.f32.mrf.mxu0  ;;  %v243_v1 = vpop.f32.mrf.mxu3 }
  0xb0   :  { %v312_v6 = vpop.f32.mrf.mxu1 }
  0xb1   :  { %v313_v21 = vadd.f32 %v312_v6, %v213_v46 }
  0xb3   :  { %v326_v12 = vpop.f32.mrf.mxu2 }
  0xb4   :  { %v327_v33 = vadd.f32 %v326_v12, %v1668_v50 }
  0xb5   :  { %v354_v7 = vpop.f32.mrf.mxu0  ;;  %v340_v13 = vpop.f32.mrf.mxu3 }
  0xb6   :  { %v355_v22 = vadd.f32 %v354_v7, %v255_v47  ;;  %v341_v27 = vadd.f32 %v340_v13, %v1670_v51 }
  0xb8   :  { %v314_v14 = vpop.f32.mrf.mxu1 }
  0xb9   :  { %v315_v29 = vadd.f32 %v314_v14, %v215_v56 }
  0xbb   :  { %v328_v16 = vpop.f32.mrf.mxu2 }
  0xbc   :  { %v329_v45 = vadd.f32 %v328_v16, %v229_v0 }
  0xbd   :  { %v356_v15 = vpop.f32.mrf.mxu0  ;;  %v342_v17 = vpop.f32.mrf.mxu3 }
  0xbe   :  { %v357_v31 = vadd.f32 %v356_v15, %v257_v57  ;;  %v343_v48 = vadd.f32 %v342_v17, %v243_v1 }
 0x121   :  { %v561_v18 = vpop.f32.mrf.mxu1 }
 0x122   :  { %v603_v19 = vpop.f32.mrf.mxu0  ;;  %v608_v23 = vadd.f32 %v561_v18, %v313_v21 }
 0x123   :  { %v611_v25 = vadd.f32 %v603_v19, %v355_v22 }
 0x124   :  { %v626_v34 = vadd.f32 %v618_v24, %v608_v23 }
 0x125   :  { %v629_v37 = vadd.f32 %v621_v26, %v611_v25 }
 0x126   :  { %v634_v46 = vmax.f32 %v626_v34, 0.0 }
 0x127   :  { %v575_v28 = vpop.f32.mrf.mxu2  ;;  %v637_v49 = vmax.f32 %v629_v37, 0.0 }
 0x128   :  { %v589_v30 = vpop.f32.mrf.mxu3  ;;  %v609_v39 = vadd.f32 %v575_v28, %v327_v33 }
 0x129   :  { %v563_v32 = vpop.f32.mrf.mxu1  ;;  %v610_v42 = vadd.f32 %v589_v30, %v341_v27 }
 0x12a   :  { %v612_v35 = vadd.f32 %v563_v32, %v315_v29  ;;  %v605_v36 = vpop.f32.mrf.mxu0  ;;  %v627_v53 = vadd.f32 %v619_v40, %v609_v39 }
 0x12b   :  { %v615_v38 = vadd.f32 %v605_v36, %v357_v31  ;;  %v628_v51 = vadd.f32 %v620_v43, %v610_v42 }
 0x12c   :  { %v630_v41 = vadd.f32 %v618_v24, %v612_v35  ;;  %v635_v61 = vmax.f32 %v627_v53, 0.0 }
 0x12d   :  { %v633_v44 = vadd.f32 %v621_v26, %v615_v38  ;;  %v636_v63 = vmax.f32 %v628_v51, 0.0 }
 0x12e   :  { %v638_v47 = vmax.f32 %v630_v41, 0.0 }
 0x12f   :  { %v641_v52 = vmax.f32 %v633_v44, 0.0  ;;  %v577_v50 = vpop.f32.mrf.mxu2 }
 0x130   :  { %v642_v54 = vpack.c.bf16 %v638_v47, %v634_v46  ;;  %v613_v55 = vadd.f32 %v577_v50, %v329_v45  ;;  %v591_v56 = vpop.f32.mrf.mxu3 }
 0x131   :  { %v645_v57 = vpack.c.bf16 %v641_v52, %v637_v49  ;;  %v614_v58 = vadd.f32 %v591_v56, %v343_v48 }
 0x132   :  { %v631_v59 = vadd.f32 %v619_v40, %v613_v55  ;;  %914 = vmatmul.bf16.vlgmr.msrb.gmra.mxu1 %v642_v54 }
 0x133   :  { %v632_v60 = vadd.f32 %v620_v43, %v614_v58  ;;  %956 = vmatmul.bf16.vlgmr.msra.gmra.mxu0 %v645_v57 }
 0x134   :  { %v639_v62 = vmax.f32 %v631_v59, 0.0 }
 0x135   :  { %v640_v0 = vmax.f32 %v632_v60, 0.0 }
 0x136   :  { %v643_v2 = vpack.c.bf16 %v639_v62, %v635_v61 }
 0x137   :  { %v644_v1 = vpack.c.bf16 %v640_v0, %v636_v63 }
 0x138   :  { %928 = vmatmul.bf16.vlgmr.msrb.gmra.mxu2 %v643_v2 }
 0x139   :  { %942 = vmatmul.bf16.vlgmr.msrb.gmra.mxu3 %v644_v1 }
 0x1af   :  { %v915_v3 = vpop.f32.mrf.mxu1 }
 0x1b0   :  { %v957_v7 = vpop.f32.mrf.mxu0  ;;  %v916_v8 = vadd.f32 %v1416_v4, %v915_v3 }
 0x1b7   :  { %v917_v9 = vpop.f32.mrf.mxu1 }
 0x1b8   :  { %v918_v11 = vadd.f32 %v1416_v4, %v917_v9  ;;  %v959_v17 = vpop.f32.mrf.mxu0 }
 0x1bb   :  { %v929_v5 = vpop.f32.mrf.mxu2 }
 0x1bc   :  { %v943_v6 = vpop.f32.mrf.mxu3  ;;  %v930_v10 = vadd.f32 %v929_v5, %v916_v8 }
 0x1be   :  { %v944_v13 = vadd.f32 %v943_v6, %v930_v10 }
 0x1c0   :  { %v958_v18 = vadd.f32 %v957_v7, %v944_v13 }
 0x1c3   :  { %v931_v12 = vpop.f32.mrf.mxu2 }
 0x1c4   :  { %v932_v14 = vadd.f32 %v931_v12, %v918_v11  ;;  %v945_v15 = vpop.f32.mrf.mxu3 }
 0x1c6   :  { %v946_v16 = vadd.f32 %v945_v15, %v932_v14 }
 0x1c8   :  { %v960_v19 = vadd.f32 %v959_v17, %v946_v16 }
 0x1ca   :  { %v1404_v20 = vpack.c.bf16 %v960_v19, %v958_v18 }
 0x1cc   :  { %1405 = vst [vmem:[#allocation10] sm:$0xff] %v1404_v20  }
 0x1cd   :  { %978 = dma.vmem_to_hbm [thread:$0]  %s971_s13, 128, %s973_s16, [#allocation4], %s1551_s18, %s1551_s18, %s1552_s19  }
 0x1ce   :  { %1543 = dma.done.wait [#allocation4], 128  }
 0x1cf   :  { %1544 = vsyncadd [#allocation4], 4294967168 }
 0x1d0   :  { %983 = vsyncpa [#allocation3], 1 }
 0x1d1   :  { %984 = vsyncpa [#allocation6], 1 }
 0x1d2   :  { %985 = vsyncpa [#allocation9], 1 }
 0x1d3   :  { %986 = vsyncpa [#allocation4], 1 }

</bundles_post_ra>
